<compile_context>
chip_gen: v5e
topology: v5e:2x2
jax: 0.10.0
libtpu: 0.0.40
codegen_flags: <defaults>
</compile_context>

<pallas_src>
import functools
import math
from typing import NamedTuple

import jax
import jax.numpy as jnp
from jax.experimental import pallas as pl
from jax.experimental.pallas import tpu as pltpu

LANE = 128
SUBLANE = 8


def _round_up(x, m):
    return ((x + m - 1) // m) * m


def _vmem_capacity_bytes():
    """Physical VMEM of the local TPU; conservative 64 MiB (v7x) if unknown."""
    try:
        info = pltpu.get_tpu_info()
        cap = getattr(info, "vmem_capacity_bytes", None)
        if cap:
            return int(cap)
    except Exception:
        pass
    return 64 << 20


def _mish_f32(y):
    """Mish(y) = y * tanh(softplus(y)) in f32 with a cheap epilogue.

    tanh(log1p(e^y)) = ((1+t)^2 - 1) / ((1+t)^2 + 1) with t = e^y.
    (1+t)^2 - 1 is computed as t*(2+t) (cancellation-free) and the divide is a
    single approximate EUP reciprocal, so the epilogue is exp + rcp (the EUP
    slot is the binding unit for narrow layers).
    """
    t = jnp.exp(jnp.minimum(y, 20.0))
    um1 = t * (2.0 + t)          # (1+t)^2 - 1
    up1 = um1 + 2.0              # (1+t)^2 + 1
    return y * (um1 * pl.reciprocal(up1, approx=True))


# ----------------------------------------------------------------------------
# One-time parameter preparation (lane-dense zero padding).
# ----------------------------------------------------------------------------
class PreparedMLP(NamedTuple):
    dims: tuple     # logical feature sizes, len = n_layers + 1
    pdims: tuple    # lane-padded feature sizes
    padded: tuple   # (w0p, b0p, w1p, b1p, ...) zero-padded, lane-dense


def prepare_mlp_params(params):
    """Pad all weights/biases to multiples of 128 ONCE; reuse every forward."""
    dims = [params[0][0].shape[0]] + [w.shape[1] for w, _ in params]
    pdims = [_round_up(d, LANE) for d in dims]
    padded = []
    for i, (w, b) in enumerate(params):
        wp = (jnp.zeros((pdims[i], pdims[i + 1]), w.dtype)
              .at[: dims[i], : dims[i + 1]].set(w))
        bp = (jnp.zeros((1, pdims[i + 1]), b.dtype)
              .at[:, : dims[i + 1]].set(jnp.asarray(b).reshape(1, -1)))
        padded += [wp, bp]
    return PreparedMLP(tuple(dims), tuple(pdims), tuple(padded))


def _choose_tm(batch, cap=512):
    tm = min(cap, _round_up(batch, SUBLANE))
    # >=2 parallel grid steps lets ("parallel",) shard across both v7x TCs.
    if _round_up(batch, tm) // tm < 2 and batch >= 2 * SUBLANE:
        tm = _round_up((batch + 1) // 2, SUBLANE)
    return tm


def _pad_x(x, bp, dp):
    b, d = x.shape
    if b == bp and d == dp:
        return x   # already lane/sublane aligned: skip the HBM copy
    return jnp.zeros((bp, dp), x.dtype).at[:b, :d].set(x)


# ----------------------------------------------------------------------------
# Fused whole-MLP kernel (weights resident in VMEM, batch-tiled grid).
# ----------------------------------------------------------------------------
def _fused_mlp_kernel(*refs, num_layers, apply_mish_flags, mxu_dtype):
    x_ref = refs[0]
    o_ref = refs[-1]
    h = x_ref[...]
    for i in range(num_layers):
        w = refs[1 + 2 * i][...]
        b = refs[2 + 2 * i][...].astype(jnp.float32)
        op_dtype = w.dtype if mxu_dtype is None else mxu_dtype
        y = jnp.dot(h.astype(op_dtype), w.astype(op_dtype),
                    preferred_element_type=jnp.float32) + b
        if apply_mish_flags[i]:
            y = _mish_f32(y)
        h = y
    o_ref[...] = h.astype(o_ref.dtype)


def mlp_forward_fused(x, prepared, last_activation=False, *, tm=None,
                      mxu_dtype=None, single_buffer_weights=True):
    """Single fused pallas_call over the whole MLP.  Feature padding is
    mathematically inert (zero weights/bias, Mish(0)=0)."""
    dims, pdims, padded = prepared
    n = len(dims) - 1
    B = x.shape[0]
    if tm is None:
        tm = _choose_tm(B)
    Bp = _round_up(B, tm)
    xp = _pad_x(x, Bp, pdims[0])

    apply_mish = tuple((i < n - 1) or last_activation for i in range(n))
    kernel = functools.partial(_fused_mlp_kernel, num_layers=n,
                               apply_mish_flags=apply_mish, mxu_dtype=mxu_dtype)

    flops = 2 * Bp * sum(pdims[i] * pdims[i + 1] for i in range(n))
    transc = Bp * sum(pdims[i + 1] for i in range(n) if apply_mish[i])
    bytes_accessed = (xp.size * xp.dtype.itemsize
                      + sum(p.size * p.dtype.itemsize for p in padded)
                      + Bp * pdims[-1] * x.dtype.itemsize)
    vmem_limit = int(0.85 * _vmem_capacity_bytes())

    def build(single_buffer):
        res_kwargs = {}
        if single_buffer and hasattr(pl, "Buffered"):
            # Resident (constant index_map) blocks don't need double-buffering.
            res_kwargs = dict(pipeline_mode=pl.Buffered(1))
        in_specs = [pl.BlockSpec((tm, pdims[0]), lambda m: (m, 0))]
        for i in range(n):
            in_specs.append(pl.BlockSpec((pdims[i], pdims[i + 1]),
                                         lambda m: (0, 0), **res_kwargs))
            in_specs.append(pl.BlockSpec((1, pdims[i + 1]),
                                         lambda m: (0, 0), **res_kwargs))
        return pl.pallas_call(
            kernel,
            out_shape=jax.ShapeDtypeStruct((Bp, pdims[-1]), x.dtype),
            grid=(Bp // tm,),
            in_specs=in_specs,
            out_specs=pl.BlockSpec((tm, pdims[-1]), lambda m: (m, 0)),
            compiler_params=pltpu.CompilerParams(
                dimension_semantics=("parallel",),
                vmem_limit_bytes=vmem_limit),
            cost_estimate=pl.CostEstimate(
                flops=flops, transcendentals=transc,
                bytes_accessed=bytes_accessed),
        )

    if single_buffer_weights:
        try:
            out = build(True)(xp, *padded)
        except Exception:
            # Older Pallas without pipeline_mode / Buffered(1): double-buffer.
            out = build(False)(xp, *padded)
    else:
        out = build(False)(xp, *padded)

    if Bp == B and pdims[-1] == dims[-1]:
        return out
    return out[:B, : dims[-1]]


# ----------------------------------------------------------------------------
# Fallback: per-layer tiled matmul kernels (layers too wide to keep resident).
# Activations stay lane-padded between layers; pad once, slice once at the end.
# ----------------------------------------------------------------------------
def _linear_tiled_kernel(x_ref, w_ref, b_ref, o_ref, acc_ref, *, apply_mish,
                         mxu_dtype):
    @pl.when(pl.program_id(2) == 0)
    def _():
        acc_ref[...] = jnp.zeros_like(acc_ref)

    a = x_ref[...]
    w = w_ref[...]
    if mxu_dtype is not None:
        a = a.astype(mxu_dtype)
        w = w.astype(mxu_dtype)
    acc_ref[...] += jnp.dot(a, w, preferred_element_type=jnp.float32)

    @pl.when(pl.program_id(2) == pl.num_programs(2) - 1)
    def _():
        y = acc_ref[...] + b_ref[...].astype(jnp.float32)
        if apply_mish:
            y = _mish_f32(y)
        o_ref[...] = y.astype(o_ref.dtype)


def _pick_tile(pdim, target, granule=LANE):
    """Largest multiple of `granule` dividing `pdim`, not exceeding `target`."""
    best = granule
    t = granule
    limit = min(target, pdim)
    while t <= limit:
        if pdim % t == 0:
            best = t
        t += granule
    return best


def _linear_tiled_padded(xp, wp, bp, *, apply_mish, tm, tn, tk, out_dtype,
                         mxu_dtype, vmem_limit):
    Bp, Kp = xp.shape
    Np = wp.shape[1]
    kernel = functools.partial(_linear_tiled_kernel, apply_mish=apply_mish,
                               mxu_dtype=mxu_dtype)
    return pl.pallas_call(
        kernel,
        out_shape=jax.ShapeDtypeStruct((Bp, Np), out_dtype),
        grid=(Bp // tm, Np // tn, Kp // tk),
        in_specs=[pl.BlockSpec((tm, tk), lambda i, j, k: (i, k)),
                  pl.BlockSpec((tk, tn), lambda i, j, k: (k, j)),
                  pl.BlockSpec((1, tn), lambda i, j, k: (0, j))],
        out_specs=pl.BlockSpec((tm, tn), lambda i, j, k: (i, j)),
        scratch_shapes=[pltpu.VMEM((tm, tn), jnp.float32)],
        compiler_params=pltpu.CompilerParams(
            dimension_semantics=("parallel", "parallel", "arbitrary"),
            vmem_limit_bytes=vmem_limit),
        cost_estimate=pl.CostEstimate(
            flops=2 * Bp * Np * Kp,
            transcendentals=Bp * Np if apply_mish else 0,
            bytes_accessed=(xp.size * xp.dtype.itemsize
                            + wp.size * wp.dtype.itemsize
                            + bp.size * bp.dtype.itemsize
                            + Bp * Np * jnp.dtype(out_dtype).itemsize)),
    )(xp, wp, bp)


def mlp_forward_tiled(x, prepared, last_activation=False, *, tm=None, tn=512,
                      tk=512, mxu_dtype=None):
    dims, pdims, padded = prepared
    n = len(dims) - 1
    B = x.shape[0]
    if tm is None:
        tm = _choose_tm(B)
    tm = _round_up(min(tm, _round_up(B, SUBLANE)), SUBLANE)
    Bp = _round_up(B, tm)
    vmem_limit = int(0.85 * _vmem_capacity_bytes())

    h = _pad_x(x, Bp, pdims[0])
    for i in range(n):
        h = _linear_tiled_padded(
            h, padded[2 * i], padded[2 * i + 1],
            apply_mish=(i < n - 1) or last_activation,
            tm=tm, tn=_pick_tile(pdims[i + 1], tn), tk=_pick_tile(pdims[i], tk),
            out_dtype=x.dtype, mxu_dtype=mxu_dtype, vmem_limit=vmem_limit)

    if Bp == B and pdims[-1] == dims[-1]:
        return h
    return h[:B, : dims[-1]]


# ----------------------------------------------------------------------------
# Dispatcher: fuse whole MLP when it fits a generation-aware VMEM budget,
# otherwise fall back to per-layer tiled kernels.
# ----------------------------------------------------------------------------
def mlp_forward(x, params=None, last_activation=False, *, prepared=None,
                mxu_dtype=None):
    if prepared is None:
        prepared = prepare_mlp_params(params)
    dims, pdims, padded = prepared
    B = x.shape[0]
    tm = _choose_tm(B)

    capacity = _vmem_capacity_bytes()
    budget = int(0.75 * capacity)
    # 2x for (possibly) double-buffered weights/biases (Buffered(1) only adds
    # headroom), f32 chained activations, double-buffered input/output tiles.
    param_bytes = 2 * sum(p.size * p.dtype.itemsize for p in padded)
    act_bytes = 3 * tm * max(pdims) * 4
    io_bytes = 2 * tm * (pdims[0] + pdims[-1]) * x.dtype.itemsize

    if param_bytes + act_bytes + io_bytes <= budget:
        return mlp_forward_fused(x, prepared, last_activation, tm=tm,
                                 mxu_dtype=mxu_dtype)
    return mlp_forward_tiled(x, prepared, last_activation, tm=tm,
                             mxu_dtype=mxu_dtype)


# ----------------------------------------------------------------------------
# Init (mimics PyTorch nn.Linear default init) and pure-JAX reference.
# ----------------------------------------------------------------------------
def init_mlp_params(key, layer_sizes, dtype=jnp.float32):
    params = []
    for i in range(len(layer_sizes) - 1):
        fan_in, fan_out = layer_sizes[i], layer_sizes[i + 1]
        key, wk, bk = jax.random.split(key, 3)
        bound = 1.0 / math.sqrt(fan_in)
        w = jax.random.uniform(wk, (fan_in, fan_out), dtype, -bound, bound)
        b = jax.random.uniform(bk, (1, fan_out), dtype, -bound, bound)
        params.append((w, b))
    return params


def mlp_reference(x, params, last_activation=False):
    h = x.astype(jnp.float32)
    n = len(params)
    for i, (w, b) in enumerate(params):
        y = jnp.dot(h, w.astype(jnp.float32),
                    precision=jax.lax.Precision.HIGHEST)
        y = y + b.astype(jnp.float32).reshape(1, -1)
        if (i < n - 1) or last_activation:
            y = y * jnp.tanh(jax.nn.softplus(y))
        h = y
    return h


if __name__ == "__main__":
    key = jax.random.PRNGKey(0)

    # --- Test 1: small f32 MLP -> fused single-kernel path ------------------
    layer_sizes = [16, 32, 32, 8]
    batch = 8
    key, xk, pk = jax.random.split(key, 3)
    x = jax.random.normal(xk, (batch, layer_sizes[0]), jnp.float32)
    params = init_mlp_params(pk, layer_sizes)
    prepared = prepare_mlp_params(params)     # pad params ONCE, reuse per call

    out = jax.block_until_ready(mlp_forward(x, prepared=prepared))
    ref = mlp_reference(x, params)
    assert out.shape == (batch, layer_sizes[-1])
    assert bool(jnp.allclose(out.astype(jnp.float32), ref,
                             atol=1e-2, rtol=1e-2)), "fused MLP kernel mismatch"

    # --- Test 2: wider bf16 MLP through the per-layer tiled fallback --------
    layer_sizes2 = [192, 320, 256]
    batch2 = 96
    key, xk2, pk2 = jax.random.split(key, 3)
    x2 = jax.random.normal(xk2, (batch2, layer_sizes2[0]),
                           jnp.float32).astype(jnp.bfloat16)
    params2 = init_mlp_params(pk2, layer_sizes2, dtype=jnp.bfloat16)
    prepared2 = prepare_mlp_params(params2)

    out2 = jax.block_until_ready(mlp_forward_tiled(x2, prepared2))
    ref2 = mlp_reference(x2, params2)
    assert out2.shape == (batch2, layer_sizes2[-1])
    assert bool(jnp.allclose(out2.astype(jnp.float32), ref2,
                             atol=3e-2, rtol=3e-2)), "tiled MLP kernel mismatch"

    print("KERNEL_OK")
</pallas_src>

<mosaic_0001>
module attributes {stable_mosaic.version = 11 : i64} {
  func.func @_fused_mlp_kernel(%arg0: i32, %arg1: memref<8x128xf32, #tpu.memory_space<vmem>>, %arg2: memref<128x128xf32, #tpu.memory_space<vmem>>, %arg3: memref<1x128xf32, #tpu.memory_space<vmem>>, %arg4: memref<128x128xf32, #tpu.memory_space<vmem>>, %arg5: memref<1x128xf32, #tpu.memory_space<vmem>>, %arg6: memref<128x128xf32, #tpu.memory_space<vmem>>, %arg7: memref<1x128xf32, #tpu.memory_space<vmem>>, %arg8: memref<8x128xf32, #tpu.memory_space<vmem>>) attributes {dimension_semantics = [#tpu.dimension_semantics<parallel>], iteration_bounds = array<i64: 1>, scalar_prefetch = 0 : i64, scratch_operands = 0 : i64, tpu.core_type = #tpu.core_type<tc>, window_params = [{transform_indices = @transform_0, window_bounds = array<i64: 8, 128>}, {pipeline_mode = #tpu.pipeline_mode<synchronous>, transform_indices = @transform_1, window_bounds = array<i64: 128, 128>}, {pipeline_mode = #tpu.pipeline_mode<synchronous>, transform_indices = @transform_2, window_bounds = array<i64: 1, 128>}, {pipeline_mode = #tpu.pipeline_mode<synchronous>, transform_indices = @transform_3, window_bounds = array<i64: 128, 128>}, {pipeline_mode = #tpu.pipeline_mode<synchronous>, transform_indices = @transform_4, window_bounds = array<i64: 1, 128>}, {pipeline_mode = #tpu.pipeline_mode<synchronous>, transform_indices = @transform_5, window_bounds = array<i64: 128, 128>}, {pipeline_mode = #tpu.pipeline_mode<synchronous>, transform_indices = @transform_6, window_bounds = array<i64: 1, 128>}, {transform_indices = @transform_7, window_bounds = array<i64: 8, 128>}]} {
    %c0 = arith.constant 0 : index
    %c0_0 = arith.constant 0 : index
    %0 = vector.load %arg1[%c0, %c0_0] : memref<8x128xf32, #tpu.memory_space<vmem>>, vector<8x128xf32>
    %c0_1 = arith.constant 0 : index
    %c0_2 = arith.constant 0 : index
    %1 = vector.load %arg2[%c0_1, %c0_2] : memref<128x128xf32, #tpu.memory_space<vmem>>, vector<128x128xf32>
    %c0_3 = arith.constant 0 : index
    %c0_4 = arith.constant 0 : index
    %2 = vector.load %arg3[%c0_3, %c0_4] : memref<1x128xf32, #tpu.memory_space<vmem>>, vector<1x128xf32>
    %cst = arith.constant dense<0.000000e+00> : vector<8x128xf32>
    %3 = tpu.matmul %0, %1, %cst {dimension_numbers = #tpu.dot_dimension_numbers<[1], [0], [0], [1], [0, 0, 1, 1], [], []>} : vector<8x128xf32>, vector<128x128xf32>, vector<8x128xf32> -> vector<8x128xf32>
    %4 = vector.broadcast %2 : vector<1x128xf32> to vector<8x128xf32>
    %5 = arith.addf %3, %4 : vector<8x128xf32>
    %cst_5 = arith.constant 2.000000e+01 : f32
    %6 = vector.broadcast %cst_5 : f32 to vector<8x128xf32>
    %7 = arith.minimumf %5, %6 : vector<8x128xf32>
    %8 = math.exp %7 : vector<8x128xf32>
    %cst_6 = arith.constant 2.000000e+00 : f32
    %9 = vector.broadcast %cst_6 : f32 to vector<8x128xf32>
    %10 = arith.addf %9, %8 : vector<8x128xf32>
    %11 = arith.mulf %8, %10 : vector<8x128xf32>
    %cst_7 = arith.constant 2.000000e+00 : f32
    %12 = vector.broadcast %cst_7 : f32 to vector<8x128xf32>
    %13 = arith.addf %11, %12 : vector<8x128xf32>
    %14 = tpu.reciprocal %13 {approx = true} : vector<8x128xf32> -> vector<8x128xf32>
    %15 = arith.mulf %11, %14 : vector<8x128xf32>
    %16 = arith.mulf %5, %15 : vector<8x128xf32>
    %c0_8 = arith.constant 0 : index
    %c0_9 = arith.constant 0 : index
    %17 = vector.load %arg4[%c0_8, %c0_9] : memref<128x128xf32, #tpu.memory_space<vmem>>, vector<128x128xf32>
    %c0_10 = arith.constant 0 : index
    %c0_11 = arith.constant 0 : index
    %18 = vector.load %arg5[%c0_10, %c0_11] : memref<1x128xf32, #tpu.memory_space<vmem>>, vector<1x128xf32>
    %cst_12 = arith.constant dense<0.000000e+00> : vector<8x128xf32>
    %19 = tpu.matmul %16, %17, %cst_12 {dimension_numbers = #tpu.dot_dimension_numbers<[1], [0], [0], [1], [0, 0, 1, 1], [], []>} : vector<8x128xf32>, vector<128x128xf32>, vector<8x128xf32> -> vector<8x128xf32>
    %20 = vector.broadcast %18 : vector<1x128xf32> to vector<8x128xf32>
    %21 = arith.addf %19, %20 : vector<8x128xf32>
    %cst_13 = arith.constant 2.000000e+01 : f32
    %22 = vector.broadcast %cst_13 : f32 to vector<8x128xf32>
    %23 = arith.minimumf %21, %22 : vector<8x128xf32>
    %24 = math.exp %23 : vector<8x128xf32>
    %cst_14 = arith.constant 2.000000e+00 : f32
    %25 = vector.broadcast %cst_14 : f32 to vector<8x128xf32>
    %26 = arith.addf %25, %24 : vector<8x128xf32>
    %27 = arith.mulf %24, %26 : vector<8x128xf32>
    %cst_15 = arith.constant 2.000000e+00 : f32
    %28 = vector.broadcast %cst_15 : f32 to vector<8x128xf32>
    %29 = arith.addf %27, %28 : vector<8x128xf32>
    %30 = tpu.reciprocal %29 {approx = true} : vector<8x128xf32> -> vector<8x128xf32>
    %31 = arith.mulf %27, %30 : vector<8x128xf32>
    %32 = arith.mulf %21, %31 : vector<8x128xf32>
    %c0_16 = arith.constant 0 : index
    %c0_17 = arith.constant 0 : index
    %33 = vector.load %arg6[%c0_16, %c0_17] : memref<128x128xf32, #tpu.memory_space<vmem>>, vector<128x128xf32>
    %c0_18 = arith.constant 0 : index
    %c0_19 = arith.constant 0 : index
    %34 = vector.load %arg7[%c0_18, %c0_19] : memref<1x128xf32, #tpu.memory_space<vmem>>, vector<1x128xf32>
    %cst_20 = arith.constant dense<0.000000e+00> : vector<8x128xf32>
    %35 = tpu.matmul %32, %33, %cst_20 {dimension_numbers = #tpu.dot_dimension_numbers<[1], [0], [0], [1], [0, 0, 1, 1], [], []>} : vector<8x128xf32>, vector<128x128xf32>, vector<8x128xf32> -> vector<8x128xf32>
    %36 = vector.broadcast %34 : vector<1x128xf32> to vector<8x128xf32>
    %37 = arith.addf %35, %36 : vector<8x128xf32>
    %c0_21 = arith.constant 0 : index
    %c0_22 = arith.constant 0 : index
    %38 = vector.load %arg8[%c0_21, %c0_22] : memref<8x128xf32, #tpu.memory_space<vmem>>, vector<8x128xf32>
    tpu.vector_store %arg8[%c0_21, %c0_22], %37 {strides = array<i32>} : memref<8x128xf32, #tpu.memory_space<vmem>>, vector<8x128xf32>,
    return
  }
  func.func @transform_0(%arg0: i32) -> (i32, i32) {
    %c0_i32 = arith.constant 0 : i32
    %c0_i32_0 = arith.constant 0 : i32
    return %arg0, %c0_i32 : i32, i32
  }
  func.func @transform_1(%arg0: i32) -> (i32, i32) {
    %c0_i32 = arith.constant 0 : i32
    %c0_i32_0 = arith.constant 0 : i32
    %c0_i32_1 = arith.constant 0 : i32
    return %c0_i32, %c0_i32_0 : i32, i32
  }
  func.func @transform_2(%arg0: i32) -> (i32, i32) {
    %c0_i32 = arith.constant 0 : i32
    %c0_i32_0 = arith.constant 0 : i32
    %c0_i32_1 = arith.constant 0 : i32
    return %c0_i32, %c0_i32_0 : i32, i32
  }
  func.func @transform_3(%arg0: i32) -> (i32, i32) {
    %c0_i32 = arith.constant 0 : i32
    %c0_i32_0 = arith.constant 0 : i32
    %c0_i32_1 = arith.constant 0 : i32
    return %c0_i32, %c0_i32_0 : i32, i32
  }
  func.func @transform_4(%arg0: i32) -> (i32, i32) {
    %c0_i32 = arith.constant 0 : i32
    %c0_i32_0 = arith.constant 0 : i32
    %c0_i32_1 = arith.constant 0 : i32
    return %c0_i32, %c0_i32_0 : i32, i32
  }
  func.func @transform_5(%arg0: i32) -> (i32, i32) {
    %c0_i32 = arith.constant 0 : i32
    %c0_i32_0 = arith.constant 0 : i32
    %c0_i32_1 = arith.constant 0 : i32
    return %c0_i32, %c0_i32_0 : i32, i32
  }
  func.func @transform_6(%arg0: i32) -> (i32, i32) {
    %c0_i32 = arith.constant 0 : i32
    %c0_i32_0 = arith.constant 0 : i32
    %c0_i32_1 = arith.constant 0 : i32
    return %c0_i32, %c0_i32_0 : i32, i32
  }
  func.func @transform_7(%arg0: i32) -> (i32, i32) {
    %c0_i32 = arith.constant 0 : i32
    %c0_i32_0 = arith.constant 0 : i32
    return %arg0, %c0_i32 : i32, i32
  }
}

module attributes {stable_mosaic.version = 11 : i64} {
  func.func @_fused_mlp_kernel(%arg0: i32, %arg1: memref<8x128xf32, #tpu.memory_space<vmem>>, %arg2: memref<128x128xf32, #tpu.memory_space<vmem>>, %arg3: memref<1x128xf32, #tpu.memory_space<vmem>>, %arg4: memref<128x128xf32, #tpu.memory_space<vmem>>, %arg5: memref<1x128xf32, #tpu.memory_space<vmem>>, %arg6: memref<128x128xf32, #tpu.memory_space<vmem>>, %arg7: memref<1x128xf32, #tpu.memory_space<vmem>>, %arg8: memref<8x128xf32, #tpu.memory_space<vmem>>) attributes {dimension_semantics = [#tpu.dimension_semantics<parallel>], iteration_bounds = array<i64: 1>, scalar_prefetch = 0 : i64, scratch_operands = 0 : i64, tpu.core_type = #tpu.core_type<tc>, window_params = [{transform_indices = @transform_0, window_bounds = array<i64: 8, 128>}, {pipeline_mode = #tpu.pipeline_mode<synchronous>, transform_indices = @transform_1, window_bounds = array<i64: 128, 128>}, {pipeline_mode = #tpu.pipeline_mode<synchronous>, transform_indices = @transform_2, window_bounds = array<i64: 1, 128>}, {pipeline_mode = #tpu.pipeline_mode<synchronous>, transform_indices = @transform_3, window_bounds = array<i64: 128, 128>}, {pipeline_mode = #tpu.pipeline_mode<synchronous>, transform_indices = @transform_4, window_bounds = array<i64: 1, 128>}, {pipeline_mode = #tpu.pipeline_mode<synchronous>, transform_indices = @transform_5, window_bounds = array<i64: 128, 128>}, {pipeline_mode = #tpu.pipeline_mode<synchronous>, transform_indices = @transform_6, window_bounds = array<i64: 1, 128>}, {transform_indices = @transform_7, window_bounds = array<i64: 8, 128>}]} {
    %c0 = arith.constant 0 : index
    %c0_0 = arith.constant 0 : index
    %0 = vector.load %arg1[%c0, %c0_0] : memref<8x128xf32, #tpu.memory_space<vmem>>, vector<8x128xf32>
    %c0_1 = arith.constant 0 : index
    %c0_2 = arith.constant 0 : index
    %1 = vector.load %arg2[%c0_1, %c0_2] : memref<128x128xf32, #tpu.memory_space<vmem>>, vector<128x128xf32>
    %c0_3 = arith.constant 0 : index
    %c0_4 = arith.constant 0 : index
    %2 = vector.load %arg3[%c0_3, %c0_4] : memref<1x128xf32, #tpu.memory_space<vmem>>, vector<1x128xf32>
    %cst = arith.constant dense<0.000000e+00> : vector<8x128xf32>
    %3 = tpu.matmul %0, %1, %cst {dimension_numbers = #tpu.dot_dimension_numbers<[1], [0], [0], [1], [0, 0, 1, 1], [], []>} : vector<8x128xf32>, vector<128x128xf32>, vector<8x128xf32> -> vector<8x128xf32>
    %4 = vector.broadcast %2 : vector<1x128xf32> to vector<8x128xf32>
    %5 = arith.addf %3, %4 : vector<8x128xf32>
    %cst_5 = arith.constant 2.000000e+01 : f32
    %6 = vector.broadcast %cst_5 : f32 to vector<8x128xf32>
    %7 = arith.minimumf %5, %6 : vector<8x128xf32>
    %8 = math.exp %7 : vector<8x128xf32>
    %cst_6 = arith.constant 2.000000e+00 : f32
    %9 = vector.broadcast %cst_6 : f32 to vector<8x128xf32>
    %10 = arith.addf %9, %8 : vector<8x128xf32>
    %11 = arith.mulf %8, %10 : vector<8x128xf32>
    %cst_7 = arith.constant 2.000000e+00 : f32
    %12 = vector.broadcast %cst_7 : f32 to vector<8x128xf32>
    %13 = arith.addf %11, %12 : vector<8x128xf32>
    %14 = tpu.reciprocal %13 {approx = true} : vector<8x128xf32> -> vector<8x128xf32>
    %15 = arith.mulf %11, %14 : vector<8x128xf32>
    %16 = arith.mulf %5, %15 : vector<8x128xf32>
    %c0_8 = arith.constant 0 : index
    %c0_9 = arith.constant 0 : index
    %17 = vector.load %arg4[%c0_8, %c0_9] : memref<128x128xf32, #tpu.memory_space<vmem>>, vector<128x128xf32>
    %c0_10 = arith.constant 0 : index
    %c0_11 = arith.constant 0 : index
    %18 = vector.load %arg5[%c0_10, %c0_11] : memref<1x128xf32, #tpu.memory_space<vmem>>, vector<1x128xf32>
    %cst_12 = arith.constant dense<0.000000e+00> : vector<8x128xf32>
    %19 = tpu.matmul %16, %17, %cst_12 {dimension_numbers = #tpu.dot_dimension_numbers<[1], [0], [0], [1], [0, 0, 1, 1], [], []>} : vector<8x128xf32>, vector<128x128xf32>, vector<8x128xf32> -> vector<8x128xf32>
    %20 = vector.broadcast %18 : vector<1x128xf32> to vector<8x128xf32>
    %21 = arith.addf %19, %20 : vector<8x128xf32>
    %cst_13 = arith.constant 2.000000e+01 : f32
    %22 = vector.broadcast %cst_13 : f32 to vector<8x128xf32>
    %23 = arith.minimumf %21, %22 : vector<8x128xf32>
    %24 = math.exp %23 : vector<8x128xf32>
    %cst_14 = arith.constant 2.000000e+00 : f32
    %25 = vector.broadcast %cst_14 : f32 to vector<8x128xf32>
    %26 = arith.addf %25, %24 : vector<8x128xf32>
    %27 = arith.mulf %24, %26 : vector<8x128xf32>
    %cst_15 = arith.constant 2.000000e+00 : f32
    %28 = vector.broadcast %cst_15 : f32 to vector<8x128xf32>
    %29 = arith.addf %27, %28 : vector<8x128xf32>
    %30 = tpu.reciprocal %29 {approx = true} : vector<8x128xf32> -> vector<8x128xf32>
    %31 = arith.mulf %27, %30 : vector<8x128xf32>
    %32 = arith.mulf %21, %31 : vector<8x128xf32>
    %c0_16 = arith.constant 0 : index
    %c0_17 = arith.constant 0 : index
    %33 = vector.load %arg6[%c0_16, %c0_17] : memref<128x128xf32, #tpu.memory_space<vmem>>, vector<128x128xf32>
    %c0_18 = arith.constant 0 : index
    %c0_19 = arith.constant 0 : index
    %34 = vector.load %arg7[%c0_18, %c0_19] : memref<1x128xf32, #tpu.memory_space<vmem>>, vector<1x128xf32>
    %cst_20 = arith.constant dense<0.000000e+00> : vector<8x128xf32>
    %35 = tpu.matmul %32, %33, %cst_20 {dimension_numbers = #tpu.dot_dimension_numbers<[1], [0], [0], [1], [0, 0, 1, 1], [], []>} : vector<8x128xf32>, vector<128x128xf32>, vector<8x128xf32> -> vector<8x128xf32>
    %36 = vector.broadcast %34 : vector<1x128xf32> to vector<8x128xf32>
    %37 = arith.addf %35, %36 : vector<8x128xf32>
    %c0_21 = arith.constant 0 : index
    %c0_22 = arith.constant 0 : index
    %38 = vector.load %arg8[%c0_21, %c0_22] : memref<8x128xf32, #tpu.memory_space<vmem>>, vector<8x128xf32>
    tpu.vector_store %arg8[%c0_21, %c0_22], %37 {strides = array<i32>} : memref<8x128xf32, #tpu.memory_space<vmem>>, vector<8x128xf32>,
    return
  }
  func.func @transform_0(%arg0: i32) -> (i32, i32) {
    %c0_i32 = arith.constant 0 : i32
    %c0_i32_0 = arith.constant 0 : i32
    return %arg0, %c0_i32 : i32, i32
  }
  func.func @transform_1(%arg0: i32) -> (i32, i32) {
    %c0_i32 = arith.constant 0 : i32
    %c0_i32_0 = arith.constant 0 : i32
    %c0_i32_1 = arith.constant 0 : i32
    return %c0_i32, %c0_i32_0 : i32, i32
  }
  func.func @transform_2(%arg0: i32) -> (i32, i32) {
    %c0_i32 = arith.constant 0 : i32
    %c0_i32_0 = arith.constant 0 : i32
    %c0_i32_1 = arith.constant 0 : i32
    return %c0_i32, %c0_i32_0 : i32, i32
  }
  func.func @transform_3(%arg0: i32) -> (i32, i32) {
    %c0_i32 = arith.constant 0 : i32
    %c0_i32_0 = arith.constant 0 : i32
    %c0_i32_1 = arith.constant 0 : i32
    return %c0_i32, %c0_i32_0 : i32, i32
  }
  func.func @transform_4(%arg0: i32) -> (i32, i32) {
    %c0_i32 = arith.constant 0 : i32
    %c0_i32_0 = arith.constant 0 : i32
    %c0_i32_1 = arith.constant 0 : i32
    return %c0_i32, %c0_i32_0 : i32, i32
  }
  func.func @transform_5(%arg0: i32) -> (i32, i32) {
    %c0_i32 = arith.constant 0 : i32
    %c0_i32_0 = arith.constant 0 : i32
    %c0_i32_1 = arith.constant 0 : i32
    return %c0_i32, %c0_i32_0 : i32, i32
  }
  func.func @transform_6(%arg0: i32) -> (i32, i32) {
    %c0_i32 = arith.constant 0 : i32
    %c0_i32_0 = arith.constant 0 : i32
    %c0_i32_1 = arith.constant 0 : i32
    return %c0_i32, %c0_i32_0 : i32, i32
  }
  func.func @transform_7(%arg0: i32) -> (i32, i32) {
    %c0_i32 = arith.constant 0 : i32
    %c0_i32_0 = arith.constant 0 : i32
    return %arg0, %c0_i32 : i32, i32
  }
}

</mosaic_0001>

<bundles_post_ra>
// kernel: tpu_custom_call.1
= control target key start
LH: loop header
LB: loop body
LE: loop exit
PB: predicated region body
PF: predicated region fallthrough
CT: control target
= control target key end

     0   :  { %12 = vsyncpa [#allocation3], 0  ;;  %s464_s0 = inlined_call_operand.hbm [shape: f32[8,128], index: 0, kind: input, shape index: {}]   ;;  %s465_s1 = inlined_call_operand.hbm [shape: f32[128,128], index: 1, kind: input, shape index: {}]   ;;  %s466_s2 = inlined_call_operand.vmem [shape: f32[1,128], index: 2, kind: input, shape index: {}]   ;;  %s467_s3 = inlined_call_operand.hbm [shape: f32[128,128], index: 3, kind: input, shape index: {}]   ;;  %s468_s4 = inlined_call_operand.vmem [shape: f32[1,128], index: 4, kind: input, shape index: {}]   ;;  %s469_s5 = inlined_call_operand.hbm [shape: f32[128,128], index: 5, kind: input, shape index: {}]   ;;  %s470_s6 = inlined_call_operand.vmem [shape: f32[1,128], index: 6, kind: input, shape index: {}]   ;;  %s471_s7 = inlined_call_operand.hbm [shape: f32[8,128], index: 7, kind: output, shape index: {}]  }
   0x1   :  { %13 = vsyncpa [#allocation6], 0 }
   0x2   :  { %14 = vsyncpa [#allocation9], 0  ;;  %s31_s26 = sshll.u32 %s465_s1, 4  ;;  %s32_s26 = int_to_ptr.hbm [resolvable:$true] %s31_s26 }
   0x3   :  { %15 = vsyncpa [#allocation4], 0  ;;  %s393_s27 = smov [#allocation5]   ;;  %s21_s8 = sshll.u32 %s464_s0, 4  ;;  %s22_s8 = int_to_ptr.hbm [resolvable:$true] %s21_s8 }
   0x4   :  { %s33_s28 = sshll.u32 %s393_s27, 4  ;;  %s394_s9 = smov 128   ;;  %s34_s28 = int_to_ptr.vmem [resolvable:$true] %s33_s28 }
   0x5   :  { %s395_s10 = smov 8   ;;  %s396_s11 = smov [#allocation2]  }
   0x6   :  { %39 = dma.hbm_to_vmem [thread:$0]  %s32_s26, 2048, %s34_s28, [#allocation6], %s394_s9, %s394_s9, %s395_s10  }
   0x7   :  { %s23_s12 = sshll.u32 %s396_s11, 4  ;;  %s46_s15 = sshll.u32 %s467_s3, 4  ;;  %s24_s12 = int_to_ptr.vmem [resolvable:$true] %s23_s12  ;;  %s47_s15 = int_to_ptr.hbm [resolvable:$true] %s46_s15 }
   0x8   :  { %26 = dma.hbm_to_vmem [thread:$0]  %s22_s8, 128, %s24_s12, [#allocation3]  }
   0x9   :  { %s61_s17 = sshll.u32 %s469_s5, 4  ;;  %s397_s18 = smov [#allocation7]   ;;  %s62_s17 = int_to_ptr.hbm [resolvable:$true] %s61_s17 }
   0xa   :  { %s48_s19 = sshll.u32 %s397_s18, 4  ;;  %s398_s0 = smov [#allocation8]   ;;  %s49_s19 = int_to_ptr.vmem [resolvable:$true] %s48_s19 }
   0xb   :  { %54 = dma.hbm_to_vmem [thread:$0]  %s47_s15, 2048, %s49_s19, [#allocation6], %s394_s9, %s394_s9, %s395_s10  }
   0xc   :  { %s63_s20 = sshll.u32 %s398_s0, 4  ;;  %s64_s20 = int_to_ptr.vmem [resolvable:$true] %s63_s20 }
   0xd   :  { %69 = dma.hbm_to_vmem [thread:$0]  %s62_s17, 2048, %s64_s20, [#allocation9], %s394_s9, %s394_s9, %s395_s10  }
   0xe   :  { %385 = dma.done.wait [#allocation3], 128  }
   0xf   :  { %386 = vsyncadd [#allocation3], 4294967168 }
  0x10   :  { %387 = dma.done.wait [#allocation6], 4096  }
  0x11   :  { %388 = vsyncadd [#allocation6], 4294963200 }
  0x12   :  { %389 = dma.done.wait [#allocation9], 2048  }
  0x13   :  { %390 = vsyncadd [#allocation9], 4294965248  ;;  %v104_v0 = vld [vmem:[#allocation5 + $0x78] sm:$0xff]  ;;  %v103_v1 = vld [vmem:[#allocation5 + $0x70] sm:$0xff]  ;;  %s235_s27 = sshll.u32 %s471_s7, 4  ;;  %s236_s27 = int_to_ptr.hbm [resolvable:$true] %s235_s27 }
  0x14   :  { %109 = vmatpush.msra.mxu0 %v104_v0  ;;  %v102_v2 = vld [vmem:[#allocation5 + $0x68] sm:$0xff]  ;;  %v101_v3 = vld [vmem:[#allocation5 + $0x60] sm:$0xff]  ;;  %v100_v4 = vld [vmem:[#allocation5 + $0x58] sm:$0xff] }
  0x15   :  { %v99_v5 = vld [vmem:[#allocation5 + $0x50] sm:$0xff]  ;;  %v98_v6 = vld [vmem:[#allocation5 + $0x48] sm:$0xff]  ;;  %v97_v7 = vld [vmem:[#allocation5 + $0x40] sm:$0xff] }
  0x16   :  { %110 = vmatpush.msra.mxu0 %v103_v1  ;;  %v96_v8 = vld [vmem:[#allocation5 + $0x38] sm:$0xff]  ;;  %v95_v9 = vld [vmem:[#allocation5 + $0x30] sm:$0xff]  ;;  %v94_v10 = vld [vmem:[#allocation5 + $0x28] sm:$0xff] }
  0x17   :  { %v93_v11 = vld [vmem:[#allocation5 + $0x20] sm:$0xff]  ;;  %v92_v12 = vld [vmem:[#allocation5 + $0x18] sm:$0xff]  ;;  %v91_v13 = vld [vmem:[#allocation5 + $0x10] sm:$0xff] }
  0x18   :  { %111 = vmatpush.msra.mxu0 %v102_v2  ;;  %v90_v14 = vld [vmem:[#allocation5 + $0x8] sm:$0xff]  ;;  %v89_v15 = vld [vmem:[#allocation5] sm:$0xff]  ;;  %v88_v16 = vld [vmem:[#allocation2] sm:$0xff] }
  0x19   :  { %v153_v17 = vld [vmem:[#allocation7 + $0x78] sm:$0xff]  ;;  %v152_v18 = vld [vmem:[#allocation7 + $0x70] sm:$0xff]  ;;  %v151_v19 = vld [vmem:[#allocation7 + $0x68] sm:$0xff] }
  0x1a   :  { %112 = vmatpush.msra.mxu0 %v101_v3  ;;  %158 = vmatpush.msra.mxu1 %v153_v17  ;;  %v150_v20 = vld [vmem:[#allocation7 + $0x60] sm:$0xff]  ;;  %v149_v21 = vld [vmem:[#allocation7 + $0x58] sm:$0xff]  ;;  %v148_v22 = vld [vmem:[#allocation7 + $0x50] sm:$0xff] }
  0x1b   :  { %v147_v23 = vld [vmem:[#allocation7 + $0x48] sm:$0xff]  ;;  %v146_v24 = vld [vmem:[#allocation7 + $0x40] sm:$0xff]  ;;  %v145_v25 = vld [vmem:[#allocation7 + $0x38] sm:$0xff] }
  0x1c   :  { %113 = vmatpush.msra.mxu0 %v100_v4  ;;  %159 = vmatpush.msra.mxu1 %v152_v18  ;;  %v144_v26 = vld [vmem:[#allocation7 + $0x30] sm:$0xff]  ;;  %v143_v27 = vld [vmem:[#allocation7 + $0x28] sm:$0xff]  ;;  %v142_v28 = vld [vmem:[#allocation7 + $0x20] sm:$0xff] }
  0x1d   :  { %v141_v29 = vld [vmem:[#allocation7 + $0x18] sm:$0xff]  ;;  %v140_v30 = vld [vmem:[#allocation7 + $0x10] sm:$0xff]  ;;  %v139_v31 = vld [vmem:[#allocation7 + $0x8] sm:$0xff] }
  0x1e   :  { %114 = vmatpush.msra.mxu0 %v99_v5  ;;  %160 = vmatpush.msra.mxu1 %v151_v19  ;;  %v138_v32 = vld [vmem:[#allocation7] sm:$0xff]  ;;  %v254_v33 = vld [vmem:[%s466_s2] ss:$0 sm:$0xff]  ;;  %v201_v46 = vld [vmem:[#allocation8 + $0x70] sm:$0xff] }
  0x1f   :  { %v202_v45 = vld [vmem:[#allocation8 + $0x78] sm:$0xff]  ;;  %v200_v47 = vld [vmem:[#allocation8 + $0x68] sm:$0xff]  ;;  %v199_v48 = vld [vmem:[#allocation8 + $0x60] sm:$0xff] }
  0x20   :  { %115 = vmatpush.msra.mxu0 %v98_v6  ;;  %161 = vmatpush.msra.mxu1 %v150_v20  ;;  %v198_v49 = vld [vmem:[#allocation8 + $0x58] sm:$0xff]  ;;  %v197_v50 = vld [vmem:[#allocation8 + $0x50] sm:$0xff]  ;;  %v196_v51 = vld [vmem:[#allocation8 + $0x48] sm:$0xff] }
  0x21   :  { %207 = vmatpush.msra.mxu2 %v202_v45  ;;  %v195_v52 = vld [vmem:[#allocation8 + $0x40] sm:$0xff]  ;;  %v194_v53 = vld [vmem:[#allocation8 + $0x38] sm:$0xff]  ;;  %v193_v54 = vld [vmem:[#allocation8 + $0x30] sm:$0xff] }
  0x22   :  { %116 = vmatpush.msra.mxu0 %v97_v7  ;;  %162 = vmatpush.msra.mxu1 %v149_v21  ;;  %v192_v55 = vld [vmem:[#allocation8 + $0x28] sm:$0xff]  ;;  %v191_v56 = vld [vmem:[#allocation8 + $0x20] sm:$0xff]  ;;  %v190_v57 = vld [vmem:[#allocation8 + $0x18] sm:$0xff] }
  0x23   :  { %208 = vmatpush.msra.mxu2 %v201_v46  ;;  %v189_v58 = vld [vmem:[#allocation8 + $0x10] sm:$0xff]  ;;  %v188_v59 = vld [vmem:[#allocation8 + $0x8] sm:$0xff]  ;;  %v187_v60 = vld [vmem:[#allocation8] sm:$0xff] }
  0x24   :  { %117 = vmatpush.msra.mxu0 %v96_v8  ;;  %163 = vmatpush.msra.mxu1 %v148_v22  ;;  %v255_v61 = vld [vmem:[%s468_s4] ss:$0 sm:$0xff]  ;;  %s399_s4 = smov [#allocation10]  }
  0x25   :  { %209 = vmatpush.msra.mxu2 %v200_v47  ;;  %s233_s24 = sshll.u32 %s399_s4, 4  ;;  %s234_s24 = int_to_ptr.vmem [resolvable:$true] %s233_s24 }
  0x26   :  { %118 = vmatpush.msra.mxu0 %v95_v9  ;;  %164 = vmatpush.msra.mxu1 %v147_v23  ;;  %v256_v9 = vld [vmem:[%s470_s6] ss:$0 sm:$0xff] }
  0x27   :  { %210 = vmatpush.msra.mxu2 %v199_v48 }
  0x28   :  { %119 = vmatpush.msra.mxu0 %v94_v10  ;;  %165 = vmatpush.msra.mxu1 %v146_v24 }
  0x29   :  { %211 = vmatpush.msra.mxu2 %v198_v49 }
  0x2a   :  { %120 = vmatpush.msra.mxu0 %v93_v11  ;;  %166 = vmatpush.msra.mxu1 %v145_v25 }
  0x2b   :  { %212 = vmatpush.msra.mxu2 %v197_v50 }
  0x2c   :  { %121 = vmatpush.msra.mxu0 %v92_v12  ;;  %167 = vmatpush.msra.mxu1 %v144_v26 }
  0x2d   :  { %213 = vmatpush.msra.mxu2 %v196_v51 }
  0x2e   :  { %122 = vmatpush.msra.mxu0 %v91_v13  ;;  %168 = vmatpush.msra.mxu1 %v143_v27 }
  0x2f   :  { %214 = vmatpush.msra.mxu2 %v195_v52 }
  0x30   :  { %123 = vmatpush.msra.mxu0 %v90_v14  ;;  %169 = vmatpush.msra.mxu1 %v142_v28 }
  0x31   :  { %215 = vmatpush.msra.mxu2 %v194_v53 }
  0x32   :  { %124 = vmatpush.msra.mxu0 %v89_v15  ;;  %170 = vmatpush.msra.mxu1 %v141_v29 }
  0x33   :  { %125 = vmatmul.f32.vlgmr.msra.gmra.mxu0 %v88_v16  ;;  %216 = vmatpush.msra.mxu2 %v193_v54 }
  0x34   :  { %171 = vmatpush.msra.mxu1 %v140_v30 }
  0x35   :  { %217 = vmatpush.msra.mxu2 %v192_v55 }
  0x36   :  { %172 = vmatpush.msra.mxu1 %v139_v31 }
  0x37   :  { %218 = vmatpush.msra.mxu2 %v191_v56 }
  0x38   :  { %173 = vmatpush.msra.mxu1 %v138_v32 }
  0x39   :  { %219 = vmatpush.msra.mxu2 %v190_v57 }
  0x3b   :  { %220 = vmatpush.msra.mxu2 %v189_v58 }
  0x3d   :  { %221 = vmatpush.msra.mxu2 %v188_v59 }
  0x3f   :  { %222 = vmatpush.msra.mxu2 %v187_v60 }
  0xb0   :  { %v126_v34 = vpop.f32.mrf.mxu0 }
  0xb1   :  { %v127_v35 = vadd.f32 %v254_v33, %v126_v34 }
  0xb3   :  { %v129_v36 = vmin.f32 %v127_v35, 20.0 }
  0xb5   :  { %v130_v37 = vmul.f32 1.442695, %v129_v36 }
  0xb7   :  { %257 = vpow2.f32 %v130_v37 }
  0xbd   :  { %v258_v38 = vpop.eup %257 }
  0xbe   :  { %v132_v39 = vadd.f32 2.0, %v258_v38 }
  0xc0   :  { %v133_v40 = vmul.f32 %v258_v38, %v132_v39 }
  0xc2   :  { %v134_v41 = vadd.f32 2.0, %v133_v40 }
  0xc4   :  { %259 = vrcp.f32 %v134_v41 }
  0xca   :  { %v260_v42 = vpop.eup %259 }
  0xcb   :  { %v136_v43 = vmul.f32 %v260_v42, %v133_v40 }
  0xcd   :  { %v137_v44 = vmul.f32 %v136_v43, %v127_v35 }
  0xcf   :  { %174 = vmatmul.f32.vlgmr.msra.gmra.mxu1 %v137_v44 }
 0x14c   :  { %v175_v62 = vpop.f32.mrf.mxu1 }
 0x14d   :  { %v176_v63 = vadd.f32 %v255_v61, %v175_v62 }
 0x14f   :  { %v178_v0 = vmin.f32 %v176_v63, 20.0 }
 0x151   :  { %v179_v1 = vmul.f32 1.442695, %v178_v0 }
 0x153   :  { %261 = vpow2.f32 %v179_v1 }
 0x159   :  { %v262_v2 = vpop.eup %261 }
 0x15a   :  { %v181_v3 = vadd.f32 2.0, %v262_v2 }
 0x15c   :  { %v182_v4 = vmul.f32 %v262_v2, %v181_v3 }
 0x15e   :  { %v183_v5 = vadd.f32 2.0, %v182_v4 }
 0x160   :  { %263 = vrcp.f32 %v183_v5 }
 0x166   :  { %v264_v6 = vpop.eup %263 }
 0x167   :  { %v185_v7 = vmul.f32 %v264_v6, %v182_v4 }
 0x169   :  { %v186_v8 = vmul.f32 %v185_v7, %v176_v63 }
 0x16b   :  { %223 = vmatmul.f32.vlgmr.msra.gmra.mxu2 %v186_v8 }
 0x1ee   :  { %v224_v10 = vpop.f32.mrf.mxu2 }
 0x1ef   :  { %v225_v11 = vadd.f32 %v256_v9, %v224_v10 }
 0x1f1   :  { %227 = vst [vmem:[#allocation10] sm:$0xff] %v225_v11 }
 0x1f2   :  { %238 = dma.vmem_to_hbm [thread:$0]  %s234_s24, 128, %s236_s27, [#allocation4]  }
 0x1f3   :  { %391 = dma.done.wait [#allocation4], 128  }
 0x1f4   :  { %392 = vsyncadd [#allocation4], 4294967168 }
 0x1f5   :  { %243 = vsyncpa [#allocation3], 1 }
 0x1f6   :  { %244 = vsyncpa [#allocation6], 1 }
 0x1f7   :  { %245 = vsyncpa [#allocation9], 1 }
 0x1f8   :  { %246 = vsyncpa [#allocation4], 1 }

// kernel: tpu_custom_call.1
= control target key start
LH: loop header
LB: loop body
LE: loop exit
PB: predicated region body
PF: predicated region fallthrough
CT: control target
= control target key end

     0   :  { %12 = vsyncpa [#allocation3], 0  ;;  %s464_s0 = inlined_call_operand.hbm [shape: f32[8,128], index: 0, kind: input, shape index: {}]   ;;  %s465_s1 = inlined_call_operand.hbm [shape: f32[128,128], index: 1, kind: input, shape index: {}]   ;;  %s466_s2 = inlined_call_operand.vmem [shape: f32[1,128], index: 2, kind: input, shape index: {}]   ;;  %s467_s3 = inlined_call_operand.hbm [shape: f32[128,128], index: 3, kind: input, shape index: {}]   ;;  %s468_s4 = inlined_call_operand.vmem [shape: f32[1,128], index: 4, kind: input, shape index: {}]   ;;  %s469_s5 = inlined_call_operand.hbm [shape: f32[128,128], index: 5, kind: input, shape index: {}]   ;;  %s470_s6 = inlined_call_operand.vmem [shape: f32[1,128], index: 6, kind: input, shape index: {}]   ;;  %s471_s7 = inlined_call_operand.hbm [shape: f32[8,128], index: 7, kind: output, shape index: {}]  }
   0x1   :  { %13 = vsyncpa [#allocation6], 0 }
   0x2   :  { %14 = vsyncpa [#allocation9], 0  ;;  %s31_s26 = sshll.u32 %s465_s1, 4  ;;  %s32_s26 = int_to_ptr.hbm [resolvable:$true] %s31_s26 }
   0x3   :  { %15 = vsyncpa [#allocation4], 0  ;;  %s393_s27 = smov [#allocation5]   ;;  %s21_s8 = sshll.u32 %s464_s0, 4  ;;  %s22_s8 = int_to_ptr.hbm [resolvable:$true] %s21_s8 }
   0x4   :  { %s33_s28 = sshll.u32 %s393_s27, 4  ;;  %s394_s9 = smov 128   ;;  %s34_s28 = int_to_ptr.vmem [resolvable:$true] %s33_s28 }
   0x5   :  { %s395_s10 = smov 8   ;;  %s396_s11 = smov [#allocation2]  }
   0x6   :  { %39 = dma.hbm_to_vmem [thread:$0]  %s32_s26, 2048, %s34_s28, [#allocation6], %s394_s9, %s394_s9, %s395_s10  }
   0x7   :  { %s23_s12 = sshll.u32 %s396_s11, 4  ;;  %s46_s15 = sshll.u32 %s467_s3, 4  ;;  %s24_s12 = int_to_ptr.vmem [resolvable:$true] %s23_s12  ;;  %s47_s15 = int_to_ptr.hbm [resolvable:$true] %s46_s15 }
   0x8   :  { %26 = dma.hbm_to_vmem [thread:$0]  %s22_s8, 128, %s24_s12, [#allocation3]  }
   0x9   :  { %s61_s17 = sshll.u32 %s469_s5, 4  ;;  %s397_s18 = smov [#allocation7]   ;;  %s62_s17 = int_to_ptr.hbm [resolvable:$true] %s61_s17 }
   0xa   :  { %s48_s19 = sshll.u32 %s397_s18, 4  ;;  %s398_s0 = smov [#allocation8]   ;;  %s49_s19 = int_to_ptr.vmem [resolvable:$true] %s48_s19 }
   0xb   :  { %54 = dma.hbm_to_vmem [thread:$0]  %s47_s15, 2048, %s49_s19, [#allocation6], %s394_s9, %s394_s9, %s395_s10  }
   0xc   :  { %s63_s20 = sshll.u32 %s398_s0, 4  ;;  %s64_s20 = int_to_ptr.vmem [resolvable:$true] %s63_s20 }
   0xd   :  { %69 = dma.hbm_to_vmem [thread:$0]  %s62_s17, 2048, %s64_s20, [#allocation9], %s394_s9, %s394_s9, %s395_s10  }
   0xe   :  { %385 = dma.done.wait [#allocation3], 128  }
   0xf   :  { %386 = vsyncadd [#allocation3], 4294967168 }
  0x10   :  { %387 = dma.done.wait [#allocation6], 4096  }
  0x11   :  { %388 = vsyncadd [#allocation6], 4294963200 }
  0x12   :  { %389 = dma.done.wait [#allocation9], 2048  }
  0x13   :  { %390 = vsyncadd [#allocation9], 4294965248  ;;  %v104_v0 = vld [vmem:[#allocation5 + $0x78] sm:$0xff]  ;;  %v103_v1 = vld [vmem:[#allocation5 + $0x70] sm:$0xff]  ;;  %s235_s27 = sshll.u32 %s471_s7, 4  ;;  %s236_s27 = int_to_ptr.hbm [resolvable:$true] %s235_s27 }
  0x14   :  { %109 = vmatpush.msra.mxu0 %v104_v0  ;;  %v102_v2 = vld [vmem:[#allocation5 + $0x68] sm:$0xff]  ;;  %v101_v3 = vld [vmem:[#allocation5 + $0x60] sm:$0xff]  ;;  %v100_v4 = vld [vmem:[#allocation5 + $0x58] sm:$0xff] }
  0x15   :  { %v99_v5 = vld [vmem:[#allocation5 + $0x50] sm:$0xff]  ;;  %v98_v6 = vld [vmem:[#allocation5 + $0x48] sm:$0xff]  ;;  %v97_v7 = vld [vmem:[#allocation5 + $0x40] sm:$0xff] }
  0x16   :  { %110 = vmatpush.msra.mxu0 %v103_v1  ;;  %v96_v8 = vld [vmem:[#allocation5 + $0x38] sm:$0xff]  ;;  %v95_v9 = vld [vmem:[#allocation5 + $0x30] sm:$0xff]  ;;  %v94_v10 = vld [vmem:[#allocation5 + $0x28] sm:$0xff] }
  0x17   :  { %v93_v11 = vld [vmem:[#allocation5 + $0x20] sm:$0xff]  ;;  %v92_v12 = vld [vmem:[#allocation5 + $0x18] sm:$0xff]  ;;  %v91_v13 = vld [vmem:[#allocation5 + $0x10] sm:$0xff] }
  0x18   :  { %111 = vmatpush.msra.mxu0 %v102_v2  ;;  %v90_v14 = vld [vmem:[#allocation5 + $0x8] sm:$0xff]  ;;  %v89_v15 = vld [vmem:[#allocation5] sm:$0xff]  ;;  %v88_v16 = vld [vmem:[#allocation2] sm:$0xff] }
  0x19   :  { %v153_v17 = vld [vmem:[#allocation7 + $0x78] sm:$0xff]  ;;  %v152_v18 = vld [vmem:[#allocation7 + $0x70] sm:$0xff]  ;;  %v151_v19 = vld [vmem:[#allocation7 + $0x68] sm:$0xff] }
  0x1a   :  { %112 = vmatpush.msra.mxu0 %v101_v3  ;;  %158 = vmatpush.msra.mxu1 %v153_v17  ;;  %v150_v20 = vld [vmem:[#allocation7 + $0x60] sm:$0xff]  ;;  %v149_v21 = vld [vmem:[#allocation7 + $0x58] sm:$0xff]  ;;  %v148_v22 = vld [vmem:[#allocation7 + $0x50] sm:$0xff] }
  0x1b   :  { %v147_v23 = vld [vmem:[#allocation7 + $0x48] sm:$0xff]  ;;  %v146_v24 = vld [vmem:[#allocation7 + $0x40] sm:$0xff]  ;;  %v145_v25 = vld [vmem:[#allocation7 + $0x38] sm:$0xff] }
  0x1c   :  { %113 = vmatpush.msra.mxu0 %v100_v4  ;;  %159 = vmatpush.msra.mxu1 %v152_v18  ;;  %v144_v26 = vld [vmem:[#allocation7 + $0x30] sm:$0xff]  ;;  %v143_v27 = vld [vmem:[#allocation7 + $0x28] sm:$0xff]  ;;  %v142_v28 = vld [vmem:[#allocation7 + $0x20] sm:$0xff] }
  0x1d   :  { %v141_v29 = vld [vmem:[#allocation7 + $0x18] sm:$0xff]  ;;  %v140_v30 = vld [vmem:[#allocation7 + $0x10] sm:$0xff]  ;;  %v139_v31 = vld [vmem:[#allocation7 + $0x8] sm:$0xff] }
  0x1e   :  { %114 = vmatpush.msra.mxu0 %v99_v5  ;;  %160 = vmatpush.msra.mxu1 %v151_v19  ;;  %v138_v32 = vld [vmem:[#allocation7] sm:$0xff]  ;;  %v254_v33 = vld [vmem:[%s466_s2] ss:$0 sm:$0xff]  ;;  %v201_v46 = vld [vmem:[#allocation8 + $0x70] sm:$0xff] }
  0x1f   :  { %v202_v45 = vld [vmem:[#allocation8 + $0x78] sm:$0xff]  ;;  %v200_v47 = vld [vmem:[#allocation8 + $0x68] sm:$0xff]  ;;  %v199_v48 = vld [vmem:[#allocation8 + $0x60] sm:$0xff] }
  0x20   :  { %115 = vmatpush.msra.mxu0 %v98_v6  ;;  %161 = vmatpush.msra.mxu1 %v150_v20  ;;  %v198_v49 = vld [vmem:[#allocation8 + $0x58] sm:$0xff]  ;;  %v197_v50 = vld [vmem:[#allocation8 + $0x50] sm:$0xff]  ;;  %v196_v51 = vld [vmem:[#allocation8 + $0x48] sm:$0xff] }
  0x21   :  { %207 = vmatpush.msra.mxu2 %v202_v45  ;;  %v195_v52 = vld [vmem:[#allocation8 + $0x40] sm:$0xff]  ;;  %v194_v53 = vld [vmem:[#allocation8 + $0x38] sm:$0xff]  ;;  %v193_v54 = vld [vmem:[#allocation8 + $0x30] sm:$0xff] }
  0x22   :  { %116 = vmatpush.msra.mxu0 %v97_v7  ;;  %162 = vmatpush.msra.mxu1 %v149_v21  ;;  %v192_v55 = vld [vmem:[#allocation8 + $0x28] sm:$0xff]  ;;  %v191_v56 = vld [vmem:[#allocation8 + $0x20] sm:$0xff]  ;;  %v190_v57 = vld [vmem:[#allocation8 + $0x18] sm:$0xff] }
  0x23   :  { %208 = vmatpush.msra.mxu2 %v201_v46  ;;  %v189_v58 = vld [vmem:[#allocation8 + $0x10] sm:$0xff]  ;;  %v188_v59 = vld [vmem:[#allocation8 + $0x8] sm:$0xff]  ;;  %v187_v60 = vld [vmem:[#allocation8] sm:$0xff] }
  0x24   :  { %117 = vmatpush.msra.mxu0 %v96_v8  ;;  %163 = vmatpush.msra.mxu1 %v148_v22  ;;  %v255_v61 = vld [vmem:[%s468_s4] ss:$0 sm:$0xff]  ;;  %s399_s4 = smov [#allocation10]  }
  0x25   :  { %209 = vmatpush.msra.mxu2 %v200_v47  ;;  %s233_s24 = sshll.u32 %s399_s4, 4  ;;  %s234_s24 = int_to_ptr.vmem [resolvable:$true] %s233_s24 }
  0x26   :  { %118 = vmatpush.msra.mxu0 %v95_v9  ;;  %164 = vmatpush.msra.mxu1 %v147_v23  ;;  %v256_v9 = vld [vmem:[%s470_s6] ss:$0 sm:$0xff] }
  0x27   :  { %210 = vmatpush.msra.mxu2 %v199_v48 }
  0x28   :  { %119 = vmatpush.msra.mxu0 %v94_v10  ;;  %165 = vmatpush.msra.mxu1 %v146_v24 }
  0x29   :  { %211 = vmatpush.msra.mxu2 %v198_v49 }
  0x2a   :  { %120 = vmatpush.msra.mxu0 %v93_v11  ;;  %166 = vmatpush.msra.mxu1 %v145_v25 }
  0x2b   :  { %212 = vmatpush.msra.mxu2 %v197_v50 }
  0x2c   :  { %121 = vmatpush.msra.mxu0 %v92_v12  ;;  %167 = vmatpush.msra.mxu1 %v144_v26 }
  0x2d   :  { %213 = vmatpush.msra.mxu2 %v196_v51 }
  0x2e   :  { %122 = vmatpush.msra.mxu0 %v91_v13  ;;  %168 = vmatpush.msra.mxu1 %v143_v27 }
  0x2f   :  { %214 = vmatpush.msra.mxu2 %v195_v52 }
  0x30   :  { %123 = vmatpush.msra.mxu0 %v90_v14  ;;  %169 = vmatpush.msra.mxu1 %v142_v28 }
  0x31   :  { %215 = vmatpush.msra.mxu2 %v194_v53 }
  0x32   :  { %124 = vmatpush.msra.mxu0 %v89_v15  ;;  %170 = vmatpush.msra.mxu1 %v141_v29 }
  0x33   :  { %125 = vmatmul.f32.vlgmr.msra.gmra.mxu0 %v88_v16  ;;  %216 = vmatpush.msra.mxu2 %v193_v54 }
  0x34   :  { %171 = vmatpush.msra.mxu1 %v140_v30 }
  0x35   :  { %217 = vmatpush.msra.mxu2 %v192_v55 }
  0x36   :  { %172 = vmatpush.msra.mxu1 %v139_v31 }
  0x37   :  { %218 = vmatpush.msra.mxu2 %v191_v56 }
  0x38   :  { %173 = vmatpush.msra.mxu1 %v138_v32 }
  0x39   :  { %219 = vmatpush.msra.mxu2 %v190_v57 }
  0x3b   :  { %220 = vmatpush.msra.mxu2 %v189_v58 }
  0x3d   :  { %221 = vmatpush.msra.mxu2 %v188_v59 }
  0x3f   :  { %222 = vmatpush.msra.mxu2 %v187_v60 }
  0xb0   :  { %v126_v34 = vpop.f32.mrf.mxu0 }
  0xb1   :  { %v127_v35 = vadd.f32 %v254_v33, %v126_v34 }
  0xb3   :  { %v129_v36 = vmin.f32 %v127_v35, 20.0 }
  0xb5   :  { %v130_v37 = vmul.f32 1.442695, %v129_v36 }
  0xb7   :  { %257 = vpow2.f32 %v130_v37 }
  0xbd   :  { %v258_v38 = vpop.eup %257 }
  0xbe   :  { %v132_v39 = vadd.f32 2.0, %v258_v38 }
  0xc0   :  { %v133_v40 = vmul.f32 %v258_v38, %v132_v39 }
  0xc2   :  { %v134_v41 = vadd.f32 2.0, %v133_v40 }
  0xc4   :  { %259 = vrcp.f32 %v134_v41 }
  0xca   :  { %v260_v42 = vpop.eup %259 }
  0xcb   :  { %v136_v43 = vmul.f32 %v260_v42, %v133_v40 }
  0xcd   :  { %v137_v44 = vmul.f32 %v136_v43, %v127_v35 }
  0xcf   :  { %174 = vmatmul.f32.vlgmr.msra.gmra.mxu1 %v137_v44 }
 0x14c   :  { %v175_v62 = vpop.f32.mrf.mxu1 }
 0x14d   :  { %v176_v63 = vadd.f32 %v255_v61, %v175_v62 }
 0x14f   :  { %v178_v0 = vmin.f32 %v176_v63, 20.0 }
 0x151   :  { %v179_v1 = vmul.f32 1.442695, %v178_v0 }
 0x153   :  { %261 = vpow2.f32 %v179_v1 }
 0x159   :  { %v262_v2 = vpop.eup %261 }
 0x15a   :  { %v181_v3 = vadd.f32 2.0, %v262_v2 }
 0x15c   :  { %v182_v4 = vmul.f32 %v262_v2, %v181_v3 }
 0x15e   :  { %v183_v5 = vadd.f32 2.0, %v182_v4 }
 0x160   :  { %263 = vrcp.f32 %v183_v5 }
 0x166   :  { %v264_v6 = vpop.eup %263 }
 0x167   :  { %v185_v7 = vmul.f32 %v264_v6, %v182_v4 }
 0x169   :  { %v186_v8 = vmul.f32 %v185_v7, %v176_v63 }
 0x16b   :  { %223 = vmatmul.f32.vlgmr.msra.gmra.mxu2 %v186_v8 }
 0x1ee   :  { %v224_v10 = vpop.f32.mrf.mxu2 }
 0x1ef   :  { %v225_v11 = vadd.f32 %v256_v9, %v224_v10 }
 0x1f1   :  { %227 = vst [vmem:[#allocation10] sm:$0xff] %v225_v11 }
 0x1f2   :  { %238 = dma.vmem_to_hbm [thread:$0]  %s234_s24, 128, %s236_s27, [#allocation4]  }
 0x1f3   :  { %391 = dma.done.wait [#allocation4], 128  }
 0x1f4   :  { %392 = vsyncadd [#allocation4], 4294967168 }
 0x1f5   :  { %243 = vsyncpa [#allocation3], 1 }
 0x1f6   :  { %244 = vsyncpa [#allocation6], 1 }
 0x1f7   :  { %245 = vsyncpa [#allocation9], 1 }
 0x1f8   :  { %246 = vsyncpa [#allocation4], 1 }

</bundles_post_ra>
